<compile_context>
chip_gen: v6e
topology: v6e:2x2x1
jax: 0.10.0
libtpu: 0.0.40
codegen_flags: <defaults>
</compile_context>

<pallas_src>
import functools

import jax
import jax.numpy as jnp
from jax.experimental import pallas as pl
from jax.experimental.pallas import tpu as pltpu

LANE = 128          # TPU lane width
MAX_TILE_M = 128    # batch rows per grid step cap (v5e-native, safe everywhere)
SUBLANE_BF16 = 16   # bf16 sublane packing


def _round_up(n, m):
    return ((n + m - 1) // m) * m


# ---------------------------------------------------------------------------
# Kernel: fused 3-layer MLP. bf16 operands into the MXU, f32 accumulation,
# bias-add + ReLU epilogue in f32, bf16 lane-dense output.
# ---------------------------------------------------------------------------
def qnetwork_kernel(x_ref, w1_ref, b1_ref, w2_ref, b2_ref, w3_ref, b3_ref, o_ref):
    x = x_ref[...]                                                        # [TM, Dp] bf16
    h1 = jnp.dot(x, w1_ref[...], preferred_element_type=jnp.float32) + b1_ref[...]
    h1 = jnp.maximum(h1, 0.0).astype(jnp.bfloat16)                        # ReLU
    h2 = jnp.dot(h1, w2_ref[...], preferred_element_type=jnp.float32) + b2_ref[...]
    h2 = jnp.maximum(h2, 0.0).astype(jnp.bfloat16)                        # ReLU
    q = jnp.dot(h2, w3_ref[...], preferred_element_type=jnp.float32) + b3_ref[...]
    o_ref[...] = q.astype(o_ref.dtype)                                    # [TM, Np] bf16


# ---------------------------------------------------------------------------
# One-time parameter preparation (do NOT call per forward step):
# pad every dim to a multiple of 128 lanes and cast weights to bf16.
# Zero padding keeps the contraction math exact.
# ---------------------------------------------------------------------------
def prepare_params(params):
    d_in, h1 = params["w1"].shape
    _, h2 = params["w2"].shape
    _, n_act = params["w3"].shape
    d_pad = _round_up(d_in, LANE)
    h1p = _round_up(h1, LANE)
    h2p = _round_up(h2, LANE)
    n_pad = _round_up(n_act, LANE)

    def pad2(a, rows, cols, dtype):
        a = a.astype(dtype)
        return jnp.pad(a, ((0, rows - a.shape[0]), (0, cols - a.shape[1])))

    return {
        "w1": pad2(params["w1"], d_pad, h1p, jnp.bfloat16),
        "b1": pad2(params["b1"], 1, h1p, jnp.float32),
        "w2": pad2(params["w2"], h1p, h2p, jnp.bfloat16),
        "b2": pad2(params["b2"], 1, h2p, jnp.float32),
        "w3": pad2(params["w3"], h2p, n_pad, jnp.bfloat16),
        "b3": pad2(params["b3"], 1, n_pad, jnp.float32),
    }


def _pick_tile_m(batch):
    """Adaptive batch tile: tiny tile for acting, >=2 grid steps for training."""
    b16 = _round_up(batch, SUBLANE_BF16)
    if b16 <= 2 * SUBLANE_BF16:
        return b16, b16                              # single small tile
    tile_m = min(MAX_TILE_M, _round_up((b16 + 1) // 2, SUBLANE_BF16))
    b_pad = _round_up(b16, tile_m)
    return tile_m, b_pad


# ---------------------------------------------------------------------------
# Forward wrapper. `padded` is the output of prepare_params (already bf16,
# already lane-padded) -- no per-call parameter work.
# ---------------------------------------------------------------------------
@functools.partial(jax.jit, static_argnames=("n_actions",))
def qnetwork_forward(x, padded, *, n_actions):
    B, d_in = x.shape
    d_pad, h1p = padded["w1"].shape
    _, h2p = padded["w2"].shape
    _, n_pad = padded["w3"].shape

    tile_m, b_pad = _pick_tile_m(B)
    grid = (b_pad // tile_m,)

    # Only the activations are padded per call (cheap; B x d_in is tiny).
    x_p = jnp.pad(x.astype(jnp.bfloat16), ((0, b_pad - B), (0, d_pad - d_in)))

    flops = 2 * b_pad * (d_pad * h1p + h1p * h2p + h2p * n_pad)
    bytes_accessed = (
        2 * (x_p.size + padded["w1"].size + padded["w2"].size + padded["w3"].size)
        + 4 * (padded["b1"].size + padded["b2"].size + padded["b3"].size)
        + 2 * b_pad * n_pad                                  # bf16 output
    )
    cost = pl.CostEstimate(flops=flops, transcendentals=0,
                           bytes_accessed=bytes_accessed)

    out = pl.pallas_call(
        qnetwork_kernel,
        out_shape=jax.ShapeDtypeStruct((b_pad, n_pad), jnp.bfloat16),
        grid=grid,
        in_specs=[
            # activations: tiled along batch
            pl.BlockSpec((tile_m, d_pad), lambda i: (i, 0)),
            # weights / biases: constant index_map -> VMEM-resident across steps
            pl.BlockSpec((d_pad, h1p), lambda i: (0, 0)),
            pl.BlockSpec((1, h1p), lambda i: (0, 0)),
            pl.BlockSpec((h1p, h2p), lambda i: (0, 0)),
            pl.BlockSpec((1, h2p), lambda i: (0, 0)),
            pl.BlockSpec((h2p, n_pad), lambda i: (0, 0)),
            pl.BlockSpec((1, n_pad), lambda i: (0, 0)),
        ],
        out_specs=pl.BlockSpec((tile_m, n_pad), lambda i: (i, 0)),
        compiler_params=pltpu.CompilerParams(
            dimension_semantics=("parallel",)),
        cost_estimate=cost,
    )(x_p, padded["w1"], padded["b1"], padded["w2"], padded["b2"],
      padded["w3"], padded["b3"])

    # Slice padded rows/cols off; return f32 like the torch module.
    return out[:B, :n_actions].astype(jnp.float32)


def init_qnetwork_params(key, input_dims, n_actions, hidden_layers=None):
    """Deterministic init mimicking nn.Linear's U(-1/sqrt(fan_in), 1/sqrt(fan_in))."""
    hidden_layers = hidden_layers or [256, 256]
    sizes = [input_dims] + hidden_layers + [n_actions]
    params = {}
    for i in range(len(sizes) - 1):
        fan_in, fan_out = sizes[i], sizes[i + 1]
        key, kw, kb = jax.random.split(key, 3)
        bound = 1.0 / (fan_in ** 0.5)
        # stored as [in, out] so the kernel does x @ W
        params[f"w{i + 1}"] = jax.random.uniform(
            kw, (fan_in, fan_out), jnp.float32, -bound, bound)
        params[f"b{i + 1}"] = jax.random.uniform(
            kb, (1, fan_out), jnp.float32, -bound, bound)
    return params


if __name__ == "__main__":
    key = jax.random.PRNGKey(0)
    k_params, k_x = jax.random.split(key)

    input_dims = 8       # observation space dims
    n_actions = 4        # action space size
    batch = 8            # acting-path batch (padded to a 16-row tile)
    hidden_layers = [256, 256]  # module default

    # TODO(synk): Adam optimizer, MSELoss and device plumbing from the PyTorch
    # module are training infrastructure, not part of forward().
    params = init_qnetwork_params(k_params, input_dims, n_actions, hidden_layers)
    padded = prepare_params(params)          # one-time padding/cast (not per call)
    x = jax.random.normal(k_x, (batch, input_dims), jnp.float32)

    q_vals = qnetwork_forward(x, padded, n_actions=n_actions)
    jax.block_until_ready(q_vals)
    assert q_vals.shape == (batch, n_actions)

    # Reference: same bf16 rounding of inputs/weights/activations, f32 accumulation.
    def bf(a):
        return a.astype(jnp.bfloat16).astype(jnp.float32)

    h = jnp.maximum(bf(x) @ bf(params["w1"]) + params["b1"], 0.0)
    h = jnp.maximum(bf(h) @ bf(params["w2"]) + params["b2"], 0.0)
    ref = bf(h) @ bf(params["w3"]) + params["b3"]
    assert jnp.allclose(q_vals, ref, atol=1e-2, rtol=1e-2), (
        float(jnp.max(jnp.abs(q_vals - ref))))

    # Also exercise a training-sized batch (>=2 grid steps -> both v7x cores).
    x_big = jax.random.normal(k_x, (256, input_dims), jnp.float32)
    q_big = qnetwork_forward(x_big, padded, n_actions=n_actions)
    jax.block_until_ready(q_big)
    assert q_big.shape == (256, n_actions)

    print("KERNEL_OK")
</pallas_src>

<mosaic_0001>
module attributes {stable_mosaic.version = 11 : i64} {
  func.func @qnetwork_kernel(%arg0: i32, %arg1: memref<16x128xbf16, #tpu.memory_space<vmem>>, %arg2: memref<128x256xbf16, #tpu.memory_space<vmem>>, %arg3: memref<1x256xf32, #tpu.memory_space<vmem>>, %arg4: memref<256x256xbf16, #tpu.memory_space<vmem>>, %arg5: memref<1x256xf32, #tpu.memory_space<vmem>>, %arg6: memref<256x128xbf16, #tpu.memory_space<vmem>>, %arg7: memref<1x128xf32, #tpu.memory_space<vmem>>, %arg8: memref<16x128xbf16, #tpu.memory_space<vmem>>) attributes {dimension_semantics = [#tpu.dimension_semantics<parallel>], iteration_bounds = array<i64: 1>, scalar_prefetch = 0 : i64, scratch_operands = 0 : i64, tpu.core_type = #tpu.core_type<tc>, window_params = [{transform_indices = @transform_0, window_bounds = array<i64: 16, 128>}, {pipeline_mode = #tpu.pipeline_mode<synchronous>, transform_indices = @transform_1, window_bounds = array<i64: 128, 256>}, {pipeline_mode = #tpu.pipeline_mode<synchronous>, transform_indices = @transform_2, window_bounds = array<i64: 1, 256>}, {pipeline_mode = #tpu.pipeline_mode<synchronous>, transform_indices = @transform_3, window_bounds = array<i64: 256, 256>}, {pipeline_mode = #tpu.pipeline_mode<synchronous>, transform_indices = @transform_4, window_bounds = array<i64: 1, 256>}, {pipeline_mode = #tpu.pipeline_mode<synchronous>, transform_indices = @transform_5, window_bounds = array<i64: 256, 128>}, {pipeline_mode = #tpu.pipeline_mode<synchronous>, transform_indices = @transform_6, window_bounds = array<i64: 1, 128>}, {transform_indices = @transform_7, window_bounds = array<i64: 16, 128>}]} {
    %c0 = arith.constant 0 : index
    %c0_0 = arith.constant 0 : index
    %0 = vector.load %arg1[%c0, %c0_0] : memref<16x128xbf16, #tpu.memory_space<vmem>>, vector<16x128xbf16>
    %c0_1 = arith.constant 0 : index
    %c0_2 = arith.constant 0 : index
    %1 = vector.load %arg2[%c0_1, %c0_2] : memref<128x256xbf16, #tpu.memory_space<vmem>>, vector<128x256xbf16>
    %cst = arith.constant dense<0.000000e+00> : vector<16x256xf32>
    %2 = tpu.matmul %0, %1, %cst {dimension_numbers = #tpu.dot_dimension_numbers<[1], [0], [0], [1], [0, 0, 1, 1], [], []>} : vector<16x128xbf16>, vector<128x256xbf16>, vector<16x256xf32> -> vector<16x256xf32>
    %c0_3 = arith.constant 0 : index
    %c0_4 = arith.constant 0 : index
    %3 = vector.load %arg3[%c0_3, %c0_4] : memref<1x256xf32, #tpu.memory_space<vmem>>, vector<1x256xf32>
    %4 = vector.broadcast %3 : vector<1x256xf32> to vector<16x256xf32>
    %5 = arith.addf %2, %4 : vector<16x256xf32>
    %cst_5 = arith.constant 0.000000e+00 : f32
    %6 = vector.broadcast %cst_5 : f32 to vector<16x256xf32>
    %7 = arith.maximumf %5, %6 : vector<16x256xf32>
    %8 = arith.truncf %7 : vector<16x256xf32> to vector<16x256xbf16>
    %c0_6 = arith.constant 0 : index
    %c0_7 = arith.constant 0 : index
    %9 = vector.load %arg4[%c0_6, %c0_7] : memref<256x256xbf16, #tpu.memory_space<vmem>>, vector<256x256xbf16>
    %cst_8 = arith.constant dense<0.000000e+00> : vector<16x256xf32>
    %10 = tpu.matmul %8, %9, %cst_8 {dimension_numbers = #tpu.dot_dimension_numbers<[1], [0], [0], [1], [0, 0, 1, 1], [], []>} : vector<16x256xbf16>, vector<256x256xbf16>, vector<16x256xf32> -> vector<16x256xf32>
    %c0_9 = arith.constant 0 : index
    %c0_10 = arith.constant 0 : index
    %11 = vector.load %arg5[%c0_9, %c0_10] : memref<1x256xf32, #tpu.memory_space<vmem>>, vector<1x256xf32>
    %12 = vector.broadcast %11 : vector<1x256xf32> to vector<16x256xf32>
    %13 = arith.addf %10, %12 : vector<16x256xf32>
    %cst_11 = arith.constant 0.000000e+00 : f32
    %14 = vector.broadcast %cst_11 : f32 to vector<16x256xf32>
    %15 = arith.maximumf %13, %14 : vector<16x256xf32>
    %16 = arith.truncf %15 : vector<16x256xf32> to vector<16x256xbf16>
    %c0_12 = arith.constant 0 : index
    %c0_13 = arith.constant 0 : index
    %17 = vector.load %arg6[%c0_12, %c0_13] : memref<256x128xbf16, #tpu.memory_space<vmem>>, vector<256x128xbf16>
    %cst_14 = arith.constant dense<0.000000e+00> : vector<16x128xf32>
    %18 = tpu.matmul %16, %17, %cst_14 {dimension_numbers = #tpu.dot_dimension_numbers<[1], [0], [0], [1], [0, 0, 1, 1], [], []>} : vector<16x256xbf16>, vector<256x128xbf16>, vector<16x128xf32> -> vector<16x128xf32>
    %c0_15 = arith.constant 0 : index
    %c0_16 = arith.constant 0 : index
    %19 = vector.load %arg7[%c0_15, %c0_16] : memref<1x128xf32, #tpu.memory_space<vmem>>, vector<1x128xf32>
    %20 = vector.broadcast %19 : vector<1x128xf32> to vector<16x128xf32>
    %21 = arith.addf %18, %20 : vector<16x128xf32>
    %22 = arith.truncf %21 : vector<16x128xf32> to vector<16x128xbf16>
    %c0_17 = arith.constant 0 : index
    %c0_18 = arith.constant 0 : index
    %23 = vector.load %arg8[%c0_17, %c0_18] : memref<16x128xbf16, #tpu.memory_space<vmem>>, vector<16x128xbf16>
    tpu.vector_store %arg8[%c0_17, %c0_18], %22 {strides = array<i32>} : memref<16x128xbf16, #tpu.memory_space<vmem>>, vector<16x128xbf16>,
    return
  }
  func.func @transform_0(%arg0: i32) -> (i32, i32) {
    %c0_i32 = arith.constant 0 : i32
    %c0_i32_0 = arith.constant 0 : i32
    return %arg0, %c0_i32 : i32, i32
  }
  func.func @transform_1(%arg0: i32) -> (i32, i32) {
    %c0_i32 = arith.constant 0 : i32
    %c0_i32_0 = arith.constant 0 : i32
    %c0_i32_1 = arith.constant 0 : i32
    return %c0_i32, %c0_i32_0 : i32, i32
  }
  func.func @transform_2(%arg0: i32) -> (i32, i32) {
    %c0_i32 = arith.constant 0 : i32
    %c0_i32_0 = arith.constant 0 : i32
    %c0_i32_1 = arith.constant 0 : i32
    return %c0_i32, %c0_i32_0 : i32, i32
  }
  func.func @transform_3(%arg0: i32) -> (i32, i32) {
    %c0_i32 = arith.constant 0 : i32
    %c0_i32_0 = arith.constant 0 : i32
    %c0_i32_1 = arith.constant 0 : i32
    return %c0_i32, %c0_i32_0 : i32, i32
  }
  func.func @transform_4(%arg0: i32) -> (i32, i32) {
    %c0_i32 = arith.constant 0 : i32
    %c0_i32_0 = arith.constant 0 : i32
    %c0_i32_1 = arith.constant 0 : i32
    return %c0_i32, %c0_i32_0 : i32, i32
  }
  func.func @transform_5(%arg0: i32) -> (i32, i32) {
    %c0_i32 = arith.constant 0 : i32
    %c0_i32_0 = arith.constant 0 : i32
    %c0_i32_1 = arith.constant 0 : i32
    return %c0_i32, %c0_i32_0 : i32, i32
  }
  func.func @transform_6(%arg0: i32) -> (i32, i32) {
    %c0_i32 = arith.constant 0 : i32
    %c0_i32_0 = arith.constant 0 : i32
    %c0_i32_1 = arith.constant 0 : i32
    return %c0_i32, %c0_i32_0 : i32, i32
  }
  func.func @transform_7(%arg0: i32) -> (i32, i32) {
    %c0_i32 = arith.constant 0 : i32
    %c0_i32_0 = arith.constant 0 : i32
    return %arg0, %c0_i32 : i32, i32
  }
}

</mosaic_0001>

<bundles_post_ra>
// kernel: qnetwork_forward.1
= control target key start
LH: loop header
LB: loop body
LE: loop exit
PB: predicated region body
PF: predicated region fallthrough
CT: control target
= control target key end

     0   :  { %12 = vsyncpa [#allocation3], 0  ;;  %s1008_s0 = inlined_call_operand.vmem [shape: bf16[16,128], index: 0, kind: input, shape index: {}]   ;;  %s1009_s1 = inlined_call_operand.hbm [shape: bf16[128,256], index: 1, kind: input, shape index: {}]   ;;  %s1010_s2 = inlined_call_operand.vmem [shape: f32[1,256], index: 2, kind: input, shape index: {}]   ;;  %s1011_s3 = inlined_call_operand.hbm [shape: bf16[256,256], index: 3, kind: input, shape index: {}]   ;;  %s1012_s4 = inlined_call_operand.vmem [shape: f32[1,256], index: 4, kind: input, shape index: {}]   ;;  %s1013_s5 = inlined_call_operand.hbm [shape: bf16[256,128], index: 5, kind: input, shape index: {}]   ;;  %s1014_s6 = inlined_call_operand.vmem [shape: f32[1,128], index: 6, kind: input, shape index: {}]   ;;  %s1015_s7 = inlined_call_operand.vmem [shape: bf16[16,128], index: 7, kind: output, shape index: {}]  }
   0x1   :  { %13 = vsyncpa [#allocation5], 0  ;;  %s936_s24 = smov [#allocation4]   ;;  %s937_s26 = smov [#allocation2]  }
   0x2   :  { %s35_s25 = sshll.u32 %s936_s24, 4  ;;  %s21_s27 = sshll.u32 %s937_s26, 4  ;;  %s36_s25 = int_to_ptr.vmem [resolvable:$true] %s35_s25  ;;  %s22_s27 = int_to_ptr.vmem [resolvable:$true] %s21_s27 }
   0x3   :  { %s880_s28 = scalar_lea.vmem %s36_s25, 4096  ;;  %p885_p1 = scmp.lt.s32.totalorder %s36_s25, %s36_s25 }
   0x4   :  { %p881_p0 = scmp.ne.s32.totalorder %s36_s25, %s880_s28  ;;  %p886_p2 = scmp.lt.s32.totalorder %s880_s28, %s880_s28 }
   0x6   :  { %p887_p3 = por %p886_p2, %p885_p1 }
   0x8   :  { %p888_p4 = pnand %p887_p3, %p881_p0 }
   0xa   :  { %891 = shalt.err (!%p888_p4)
}
   0xb   :  { %s938_s29 = smov 128   ;;  %s939_s30 = smov 8  }
   0xc   :  { %41 = dma.hbm_to_vmem [thread:$0]  %s1011_s3, 4096, %s36_s25, [#allocation5], %s938_s29, %s938_s29, %s939_s30  }
   0xd   :  { %s900_s10 = scalar_lea.vmem %s22_s27, 2048  ;;  %p905_p6 = scmp.lt.s32.totalorder %s22_s27, %s22_s27 }
   0xe   :  { %p901_p5 = scmp.ne.s32.totalorder %s22_s27, %s900_s10  ;;  %p906_p7 = scmp.lt.s32.totalorder %s900_s10, %s900_s10 }
  0x10   :  { %p907_p8 = por %p906_p7, %p905_p6 }
  0x12   :  { %p908_p9 = pnand %p907_p8, %p901_p5 }
  0x14   :  { %911 = shalt.err (!%p908_p9)
}
  0x15   :  { %27 = dma.hbm_to_vmem [thread:$0]  %s1009_s1, 2048, %s22_s27, [#allocation3], %s938_s29, %s938_s29, %s939_s30  }
  0x16   :  { %s940_s13 = smov [#allocation6]  }
  0x17   :  { %s49_s14 = sshll.u32 %s940_s13, 4  ;;  %s50_s14 = int_to_ptr.vmem [resolvable:$true] %s49_s14 }
  0x18   :  { %s920_s15 = scalar_lea.vmem %s50_s14, 2048  ;;  %p925_p11 = scmp.lt.s32.totalorder %s50_s14, %s50_s14 }
  0x19   :  { %p921_p10 = scmp.ne.s32.totalorder %s50_s14, %s920_s15  ;;  %p926_p12 = scmp.lt.s32.totalorder %s920_s15, %s920_s15 }
  0x1b   :  { %p927_p13 = por %p926_p12, %p925_p11 }
  0x1d   :  { %p928_p0 = pnand %p927_p13, %p921_p10 }
  0x1f   :  { %931 = shalt.err (!%p928_p0)
}
  0x20   :  { %s941_s3 = smov 64   ;;  %s942_s16 = smov 4  }
  0x21   :  { %55 = dma.hbm_to_vmem [thread:$0]  %s1013_s5, 2048, %s50_s14, [#allocation5], %s941_s3, %s941_s3, %s942_s16  }
  0x22   :  { %932 = dma.done.wait [#allocation3], 2048  }
  0x23   :  { %933 = vsyncadd [#allocation3], 4294965248 }
  0x24   :  { %934 = dma.done.wait [#allocation5], 6144  }
  0x25   :  { %935 = vsyncadd [#allocation5], 4294961152  ;;  %v943_v0 = vmov 0   ;;  %v783_v1 = vld [vmem:[#allocation2 + $0x74] ss:$8 sps:$4 sm:$0xff]   ;;  %v807_v27 = vld [vmem:[%s1008_s0] sm:$0xff]   ;;  %v88_v60 = vlaneseq }
  0x26   :  { %216 = vmatprep.mubr.bf16.mxu0 %v943_v0  ;;  %v785_v2 = vld [vmem:[#allocation2 + $0x70] ss:$8 sps:$4 sm:$0xff]   ;;  %184 = vmatprep.subr.bf16.mxu0 %v783_v1  ;;  %v786_v3 = vld [vmem:[#allocation2 + $0x64] ss:$8 sps:$4 sm:$0xff]   ;;  %v788_v4 = vld [vmem:[#allocation2 + $0x60] ss:$8 sps:$4 sm:$0xff]  }
  0x27   :  { %185 = vmatpush1.bf16.msra.mxu0 %v785_v2  ;;  %v789_v5 = vld [vmem:[#allocation2 + $0x54] ss:$8 sps:$4 sm:$0xff]   ;;  %v791_v6 = vld [vmem:[#allocation2 + $0x50] ss:$8 sps:$4 sm:$0xff]   ;;  %v792_v7 = vld [vmem:[#allocation2 + $0x44] ss:$8 sps:$4 sm:$0xff]  }
  0x28   :  { %186 = vmatprep.subr.bf16.mxu0 %v786_v3  ;;  %v794_v8 = vld [vmem:[#allocation2 + $0x40] ss:$8 sps:$4 sm:$0xff]   ;;  %v795_v9 = vld [vmem:[#allocation2 + $0x34] ss:$8 sps:$4 sm:$0xff]   ;;  %v810_v11 = vld [vmem:[#allocation4 + $0x70] ss:$8 sps:$4 sm:$0xff]  }
  0x29   :  { %v808_v10 = vld [vmem:[#allocation4 + $0x74] ss:$8 sps:$4 sm:$0xff]   ;;  %v811_v12 = vld [vmem:[#allocation4 + $0x64] ss:$8 sps:$4 sm:$0xff]   ;;  %v797_v13 = vld [vmem:[#allocation2 + $0x30] ss:$8 sps:$4 sm:$0xff]  }
  0x2a   :  { %437 = vmatprep.subr.bf16.mxu1 %v808_v10  ;;  %v813_v14 = vld [vmem:[#allocation4 + $0x60] ss:$8 sps:$4 sm:$0xff]   ;;  %v798_v15 = vld [vmem:[#allocation2 + $0x24] ss:$8 sps:$4 sm:$0xff]   ;;  %v814_v16 = vld [vmem:[#allocation4 + $0x54] ss:$8 sps:$4 sm:$0xff]  }
  0x2b   :  { %187 = vmatpush1.bf16.msra.mxu0 %v788_v4  ;;  %438 = vmatpush1.bf16.msra.mxu1 %v810_v11  ;;  %v800_v17 = vld [vmem:[#allocation2 + $0x20] ss:$8 sps:$4 sm:$0xff]   ;;  %v816_v18 = vld [vmem:[#allocation4 + $0x50] ss:$8 sps:$4 sm:$0xff]   ;;  %v801_v19 = vld [vmem:[#allocation2 + $0x14] ss:$8 sps:$4 sm:$0xff]  }
  0x2c   :  { %188 = vmatprep.subr.bf16.mxu0 %v789_v5  ;;  %439 = vmatprep.subr.bf16.mxu1 %v811_v12  ;;  %v817_v20 = vld [vmem:[#allocation4 + $0x44] ss:$8 sps:$4 sm:$0xff]   ;;  %v803_v21 = vld [vmem:[#allocation2 + $0x10] ss:$8 sps:$4 sm:$0xff]   ;;  %v819_v22 = vld [vmem:[#allocation4 + $0x40] ss:$8 sps:$4 sm:$0xff]  }
  0x2d   :  { %v804_v23 = vld [vmem:[#allocation2 + $0x4] ss:$8 sps:$4 sm:$0xff]   ;;  %v820_v24 = vld [vmem:[#allocation4 + $0x34] ss:$8 sps:$4 sm:$0xff]   ;;  %v806_v25 = vld [vmem:[#allocation2] ss:$8 sps:$4 sm:$0xff]  }
  0x2e   :  { %v822_v26 = vld [vmem:[#allocation4 + $0x30] ss:$8 sps:$4 sm:$0xff]   ;;  %v823_v28 = vld [vmem:[#allocation4 + $0x24] ss:$8 sps:$4 sm:$0xff]   ;;  %v825_v29 = vld [vmem:[#allocation4 + $0x20] ss:$8 sps:$4 sm:$0xff]  }
  0x2f   :  { %189 = vmatpush1.bf16.msra.mxu0 %v791_v6  ;;  %440 = vmatpush1.bf16.msra.mxu1 %v813_v14  ;;  %v826_v30 = vld [vmem:[#allocation4 + $0x14] ss:$8 sps:$4 sm:$0xff]   ;;  %v828_v31 = vld [vmem:[#allocation4 + $0x10] ss:$8 sps:$4 sm:$0xff]   ;;  %v829_v32 = vld [vmem:[#allocation4 + $0x4] ss:$8 sps:$4 sm:$0xff]  }
  0x30   :  { %190 = vmatprep.subr.bf16.mxu0 %v792_v7  ;;  %441 = vmatprep.subr.bf16.mxu1 %v814_v16  ;;  %v831_v33 = vld [vmem:[#allocation4] ss:$8 sps:$4 sm:$0xff]   ;;  %v832_v34 = vld [vmem:[#allocation4 + $0xf4] ss:$8 sps:$4 sm:$0xff]   ;;  %v834_v35 = vld [vmem:[#allocation4 + $0xf0] ss:$8 sps:$4 sm:$0xff]  }
  0x31   :  { %v835_v36 = vld [vmem:[#allocation4 + $0xe4] ss:$8 sps:$4 sm:$0xff]   ;;  %v837_v37 = vld [vmem:[#allocation4 + $0xe0] ss:$8 sps:$4 sm:$0xff]   ;;  %v838_v38 = vld [vmem:[#allocation4 + $0xd4] ss:$8 sps:$4 sm:$0xff]  }
  0x32   :  { %v840_v39 = vld [vmem:[#allocation4 + $0xd0] ss:$8 sps:$4 sm:$0xff]   ;;  %v841_v40 = vld [vmem:[#allocation4 + $0xc4] ss:$8 sps:$4 sm:$0xff]   ;;  %v843_v41 = vld [vmem:[#allocation4 + $0xc0] ss:$8 sps:$4 sm:$0xff]  }
  0x33   :  { %191 = vmatpush1.bf16.msra.mxu0 %v794_v8  ;;  %442 = vmatpush1.bf16.msra.mxu1 %v816_v18  ;;  %v844_v42 = vld [vmem:[#allocation4 + $0xb4] ss:$8 sps:$4 sm:$0xff]   ;;  %v846_v43 = vld [vmem:[#allocation4 + $0xb0] ss:$8 sps:$4 sm:$0xff]   ;;  %v847_v44 = vld [vmem:[#allocation4 + $0xa4] ss:$8 sps:$4 sm:$0xff]  }
  0x34   :  { %192 = vmatprep.subr.bf16.mxu0 %v795_v9  ;;  %443 = vmatprep.subr.bf16.mxu1 %v817_v20  ;;  %v849_v45 = vld [vmem:[#allocation4 + $0xa0] ss:$8 sps:$4 sm:$0xff]   ;;  %v850_v46 = vld [vmem:[#allocation4 + $0x94] ss:$8 sps:$4 sm:$0xff]   ;;  %v852_v47 = vld [vmem:[#allocation4 + $0x90] ss:$8 sps:$4 sm:$0xff]  }
  0x35   :  { %v853_v48 = vld [vmem:[#allocation4 + $0x84] ss:$8 sps:$4 sm:$0xff]   ;;  %v855_v49 = vld [vmem:[#allocation4 + $0x80] ss:$8 sps:$4 sm:$0xff]   ;;  %v856_v50 = vld [vmem:[#allocation6 + $0x78] sm:$0xff]   ;;  %v89_v61 = vshrl.u32 %v88_v60, 7 }
  0x36   :  { %v857_v51 = vld [vmem:[#allocation6 + $0x38] sm:$0xff]   ;;  %v858_v52 = vld [vmem:[#allocation6 + $0x70] sm:$0xff]   ;;  %v860_v54 = vld [vmem:[#allocation6 + $0x68] sm:$0xff]  }
  0x37   :  { %193 = vmatpush1.bf16.msra.mxu0 %v797_v13  ;;  %444 = vmatpush1.bf16.msra.mxu1 %v819_v22  ;;  %v859_v53 = vld [vmem:[#allocation6 + $0x30] sm:$0xff]   ;;  %v861_v55 = vld [vmem:[#allocation6 + $0x28] sm:$0xff]   ;;  %v862_v56 = vld [vmem:[#allocation6 + $0x60] sm:$0xff]   ;;  %v94_v62 = vsub.s32 1, %v89_v61  ;;  %v90_v63 = vsub.s32 0, %v89_v61 }
  0x38   :  { %194 = vmatprep.subr.bf16.mxu0 %v798_v15  ;;  %445 = vmatprep.subr.bf16.mxu1 %v820_v24  ;;  %v863_v57 = vld [vmem:[#allocation6 + $0x20] sm:$0xff]   ;;  %v864_v58 = vld [vmem:[#allocation6 + $0x58] sm:$0xff]   ;;  %v867_v18 = vld [vmem:[#allocation6 + $0x10] sm:$0xff]  }
  0x39   :  { %v865_v59 = vld [vmem:[#allocation6 + $0x18] sm:$0xff]   ;;  %v86_v0 = vld [vmem:[%s1010_s2] sm:$0x3]  ;;  %v869_v20 = vld [vmem:[#allocation6 + $0x8] sm:$0xff]  }
  0x3a   :  { %v95_v2 = vrot.slane %v86_v0, %v94_v62  ;;  %v91_v3 = vrot.slane %v86_v0, %v90_v63  ;;  %v871_v22 = vld [vmem:[#allocation6] sm:$0xff]  }
  0x3b   :  { %195 = vmatpush1.bf16.msra.mxu0 %v800_v17  ;;  %446 = vmatpush1.bf16.msra.mxu1 %v822_v26  ;;  %v866_v17 = vld [vmem:[#allocation6 + $0x50] sm:$0xff]  }
  0x3c   :  { %196 = vmatprep.subr.bf16.mxu0 %v801_v19  ;;  %447 = vmatprep.subr.bf16.mxu1 %v823_v28  ;;  %v868_v19 = vld [vmem:[#allocation6 + $0x48] sm:$0xff]  }
  0x3f   :  { %197 = vmatpush1.bf16.msra.mxu0 %v803_v21  ;;  %448 = vmatpush1.bf16.msra.mxu1 %v825_v29  ;;  %v870_v21 = vld [vmem:[#allocation6 + $0x40] sm:$0xff]  }
  0x40   :  { %198 = vmatprep.subr.bf16.mxu0 %v804_v23  ;;  %449 = vmatprep.subr.bf16.mxu1 %v826_v30  ;;  %v265_v23 = vld [vmem:[%s1012_s4] sm:$0x3] }
  0x41   :  { %v270_v26 = vrot.slane %v265_v23, %v90_v63 }
  0x43   :  { %199 = vmatpush1.bf16.msra.mxu0 %v806_v25  ;;  %450 = vmatpush1.bf16.msra.mxu1 %v828_v31  ;;  %v274_v25 = vrot.slane %v265_v23, %v94_v62 }
  0x44   :  { %451 = vmatprep.subr.bf16.mxu1 %v829_v32  ;;  %753 = vmatprep.subr.bf16.mxu0 %v856_v50 }
  0x46   :  { %217 = vmatmul.mubr.bf16.vlgmr.msra.gmra.mxu0 %v807_v27 }
  0x47   :  { %452 = vmatpush1.bf16.msra.mxu1 %v831_v33  ;;  %754 = vmatpush3.bf16.msra.mxu0 %v857_v51 }
  0x48   :  { %453 = vmatprep.subr.bf16.mxu1 %v832_v34  ;;  %755 = vmatprep.subr.bf16.mxu0 %v858_v52 }
  0x4b   :  { %454 = vmatpush2.bf16.msra.mxu1 %v834_v35  ;;  %756 = vmatpush3.bf16.msra.mxu0 %v859_v53 }
  0x4c   :  { %455 = vmatprep.subr.bf16.mxu1 %v835_v36  ;;  %757 = vmatprep.subr.bf16.mxu0 %v860_v54 }
  0x4f   :  { %456 = vmatpush2.bf16.msra.mxu1 %v837_v37  ;;  %758 = vmatpush3.bf16.msra.mxu0 %v861_v55 }
  0x50   :  { %457 = vmatprep.subr.bf16.mxu1 %v838_v38  ;;  %759 = vmatprep.subr.bf16.mxu0 %v862_v56 }
  0x53   :  { %458 = vmatpush2.bf16.msra.mxu1 %v840_v39  ;;  %760 = vmatpush3.bf16.msra.mxu0 %v863_v57 }
  0x54   :  { %459 = vmatprep.subr.bf16.mxu1 %v841_v40  ;;  %761 = vmatprep.subr.bf16.mxu0 %v864_v58 }
  0x57   :  { %460 = vmatpush2.bf16.msra.mxu1 %v843_v41  ;;  %762 = vmatpush3.bf16.msra.mxu0 %v865_v59 }
  0x58   :  { %461 = vmatprep.subr.bf16.mxu1 %v844_v42  ;;  %763 = vmatprep.subr.bf16.mxu0 %v866_v17 }
  0x5b   :  { %462 = vmatpush2.bf16.msra.mxu1 %v846_v43  ;;  %764 = vmatpush3.bf16.msra.mxu0 %v867_v18 }
  0x5c   :  { %463 = vmatprep.subr.bf16.mxu1 %v847_v44  ;;  %765 = vmatprep.subr.bf16.mxu0 %v868_v19  ;;  %v727_v44 = vld [vmem:[%s1014_s6] ss:$0 sm:$0xff] }
  0x5f   :  { %464 = vmatpush2.bf16.msra.mxu1 %v849_v45  ;;  %766 = vmatpush3.bf16.msra.mxu0 %v869_v20 }
  0x60   :  { %465 = vmatprep.subr.bf16.mxu1 %v850_v46  ;;  %767 = vmatprep.subr.bf16.mxu0 %v870_v21 }
  0x63   :  { %466 = vmatpush2.bf16.msra.mxu1 %v852_v47  ;;  %768 = vmatpush3.bf16.msra.mxu0 %v871_v22 }
  0x64   :  { %467 = vmatprep.subr.bf16.mxu1 %v853_v48 }
  0x67   :  { %468 = vmatpush2.bf16.msra.mxu1 %v855_v49 }
 0x106   :  { %v218_v1 = vpop.f32.mrf.mxu0 }
 0x107   :  { %v219_v8 = vadd.f32 %v218_v1, %v91_v3 }
 0x108   :  { %v220_v4 = vpop.f32.mrf.mxu0 }
 0x109   :  { %v221_v6 = vadd.f32 %v220_v4, %v95_v2  ;;  %v227_v14 = vmax.f32 %v219_v8, 0.0 }
 0x10a   :  { %v222_v5 = vpop.f32.mrf.mxu0 }
 0x10b   :  { %v223_v7 = vadd.f32 %v222_v5, %v91_v3  ;;  %v228_v12 = vmax.f32 %v221_v6, 0.0 }
 0x10c   :  { %v224_v9 = vpop.f32.mrf.mxu0 }
 0x10d   :  { %v225_v10 = vadd.f32 %v224_v9, %v95_v2  ;;  %v229_v11 = vmax.f32 %v223_v7, 0.0 }
 0x10f   :  { %v230_v13 = vmax.f32 %v225_v10, 0.0  ;;  %v231_v16 = vpack.c.bf16 %v229_v11, %v227_v14 }
 0x111   :  { %v232_v15 = vpack.c.bf16 %v230_v13, %v228_v12 }
 0x113   :  { %469 = vmatprep.mubr.bf16.mxu1 %v232_v15 }
 0x114   :  { %470 = vmatmul.mubr.bf16.vlgmr.msra.gmra.mxu1 %v231_v16 }
 0x1d4   :  { %v471_v24 = vpop.f32.mrf.mxu1 }
 0x1d5   :  { %v472_v31 = vadd.f32 %v471_v24, %v270_v26 }
 0x1d6   :  { %v473_v27 = vpop.f32.mrf.mxu1 }
 0x1d7   :  { %v474_v29 = vadd.f32 %v473_v27, %v274_v25  ;;  %v480_v37 = vmax.f32 %v472_v31, 0.0 }
 0x1d8   :  { %v475_v28 = vpop.f32.mrf.mxu1 }
 0x1d9   :  { %v476_v30 = vadd.f32 %v475_v28, %v270_v26  ;;  %v481_v35 = vmax.f32 %v474_v29, 0.0 }
 0x1da   :  { %v477_v32 = vpop.f32.mrf.mxu1 }
 0x1db   :  { %v478_v33 = vadd.f32 %v477_v32, %v274_v25  ;;  %v482_v34 = vmax.f32 %v476_v30, 0.0 }
 0x1dd   :  { %v483_v36 = vmax.f32 %v478_v33, 0.0  ;;  %v484_v39 = vpack.c.bf16 %v482_v34, %v480_v37 }
 0x1df   :  { %v485_v38 = vpack.c.bf16 %v483_v36, %v481_v35 }
 0x1e1   :  { %653 = vmatprep.mubr.bf16.mxu0 %v485_v38 }
 0x1e2   :  { %654 = vmatmul.mubr.bf16.vlgmr.msra.gmra.mxu0 %v484_v39 }
 0x2a2   :  { %v769_v40 = vpop.f32.mrf.mxu0 }
 0x2a4   :  { %v770_v41 = vpop.f32.mrf.mxu0 }
 0x2a5   :  { %v771_v43 = vadd.f32 %v770_v41, %v769_v40 }
 0x2a6   :  { %v772_v42 = vpop.f32.mrf.mxu0 }
 0x2a7   :  { %v656_v47 = vadd.f32 %v771_v43, %v727_v44 }
 0x2a8   :  { %v773_v45 = vpop.f32.mrf.mxu0 }
 0x2a9   :  { %v774_v46 = vadd.f32 %v773_v45, %v772_v42 }
 0x2ab   :  { %v659_v48 = vadd.f32 %v774_v46, %v727_v44 }
 0x2ad   :  { %v751_v49 = vpack.c.bf16 %v659_v48, %v656_v47 }
 0x2af   :  { %752 = vst [vmem:[%s1015_s7] sm:$0xff] %v751_v49  }
 0x2b0   :  { %676 = vsyncpa [#allocation3], 1 }
 0x2b1   :  { %677 = vsyncpa [#allocation5], 1 }

</bundles_post_ra>
